<compile_context>
chip_gen: v7x
topology: tpu7x:2x2x1
jax: 0.10.0
libtpu: 0.0.40
codegen_flags: <defaults>
</compile_context>

<pallas_src>
import jax
import jax.numpy as jnp
from jax.experimental import pallas as pl
from jax.experimental.pallas import tpu as pltpu


def _round_up(x, m):
    return (x + m - 1) // m * m


def _round_down(x, m):
    return x // m * m


_TM_CAP = 2048                 # max rows per M tile
_K_SINGLE_TILE_MAX = 2048      # single-K-tile fast path threshold


def _vmem_tile_budget_bytes():
    # Size tiles against the real chip: v5e/v6e have 128 MiB VMEM, v7x only 64.
    try:
        cap = int(pltpu.get_tpu_info().vmem_capacity_bytes)
    except Exception:
        cap = 64 * 1024 * 1024                      # conservative (v7x) fallback
    return max(16 * 1024 * 1024, min(cap // 2, 48 * 1024 * 1024))


# ---------------------------------------------------------------------------
# Fused matmul + bias + ELU kernels
# ---------------------------------------------------------------------------
def _matmul_bias_elu_kernel(x_ref, w_ref, b_ref, o_ref):
    # Fast path: whole (padded) weight resident in VMEM, one MXU pass per
    # M tile, bias + ELU fused, compute_dtype writeback.
    y = jnp.dot(x_ref[...], w_ref[...], preferred_element_type=jnp.float32)
    y = y + b_ref[...]
    # ELU(alpha=1): x if x > 0 else exp(x) - 1   (argument clamped for safety)
    y = jnp.where(y > 0, y, jnp.exp(jnp.minimum(y, 0.0)) - 1.0)
    o_ref[...] = y.astype(o_ref.dtype)


def _matmul_bias_elu_acc_kernel(x_ref, w_ref, b_ref, o_ref, acc_ref):
    # Fallback for very large reduction dims: K grid axis + f32 accumulator.
    k = pl.program_id(1)

    @pl.when(k == 0)
    def _init():
        acc_ref[...] = jnp.zeros_like(acc_ref)

    acc_ref[...] += jnp.dot(x_ref[...], w_ref[...],
                            preferred_element_type=jnp.float32)

    @pl.when(k == pl.num_programs(1) - 1)
    def _finalize():
        y = acc_ref[...] + b_ref[...]
        y = jnp.where(y > 0, y, jnp.exp(jnp.minimum(y, 0.0)) - 1.0)
        o_ref[...] = y.astype(o_ref.dtype)


def _plan_tiles(M, Kmat, N, compute_dtype):
    it = jnp.dtype(compute_dtype).itemsize
    budget = _vmem_tile_budget_bytes()
    n_pad = _round_up(N, 128)
    k128 = _round_up(Kmat, 128)

    if k128 <= _K_SINGLE_TILE_MAX:
        # --- fast path: no reduction grid axis, weight resident in VMEM ----
        k_pad = k128
        w_bytes = k_pad * n_pad * it * 2           # double-buffer allocation
        per_row = (k_pad + n_pad) * it * 2         # x tile + out tile (dbuf)
        tm = (budget - w_bytes - n_pad * 4) // max(per_row, 1)
        tm = max(8, min(_TM_CAP, _round_down(int(tm), 8)))
        tm = min(tm, _round_up(M, 8))
        m_pad = _round_up(M, tm)
        if m_pad // tm == 1 and M > 8:
            # >=2 balanced M blocks so both v7x TensorCores get work.
            tm = _round_up(-(-M // 2), 8)
            m_pad = _round_up(M, tm)
        return dict(fast=True, tm=tm, tk=k_pad, k_pad=k_pad, n_pad=n_pad,
                    m_pad=m_pad, budget=budget)

    # --- fallback: K grid axis with f32 accumulator (never hit by SEANet) ---
    tk = 1024
    k_pad = _round_up(Kmat, tk)
    w_bytes = tk * n_pad * it * 2
    per_row = (tk + n_pad) * it * 2 + n_pad * 4     # + f32 accumulator row
    tm = (budget - w_bytes - n_pad * 4) // max(per_row, 1)
    tm = max(8, min(1024, _round_down(int(tm), 8)))
    tm = min(tm, _round_up(M, 8))
    m_pad = _round_up(M, tm)
    return dict(fast=False, tm=tm, tk=tk, k_pad=k_pad, n_pad=n_pad,
                m_pad=m_pad, budget=budget)


def _fused_matmul_bias_elu(xcol_p, w_p, b_p, plan, out_rows):
    """elu(xcol_p @ w_p + b_p) with fused bias/activation.

    xcol_p: (m_pad, k_pad) compute_dtype   (already zero-padded)
    w_p:    (k_pad, n_pad) compute_dtype
    b_p:    (1, n_pad)     float32
    Returns (out_rows, n_pad) in compute_dtype (ragged last M block masked).
    """
    m_pad, k_pad = xcol_p.shape
    n_pad = w_p.shape[1]
    tm, tk = plan["tm"], plan["tk"]
    grid_m = m_pad // tm
    out_dtype = xcol_p.dtype
    it = jnp.dtype(out_dtype).itemsize
    vmem_limit = int(plan["budget"]) + 8 * 1024 * 1024

    cost = pl.CostEstimate(
        flops=2 * m_pad * n_pad * k_pad,
        transcendentals=m_pad * n_pad,
        bytes_accessed=(m_pad * k_pad * it          # x read once
                        + k_pad * n_pad * it        # resident weight
                        + n_pad * 4                 # bias
                        + out_rows * n_pad * it),   # output write
    )

    if plan["fast"]:
        return pl.pallas_call(
            _matmul_bias_elu_kernel,
            out_shape=jax.ShapeDtypeStruct((out_rows, n_pad), out_dtype),
            grid_spec=pltpu.PrefetchScalarGridSpec(
                num_scalar_prefetch=0,
                grid=(grid_m,),
                in_specs=[
                    pl.BlockSpec((tm, k_pad), lambda i: (i, 0)),
                    pl.BlockSpec((k_pad, n_pad), lambda i: (0, 0)),   # resident
                    pl.BlockSpec((1, n_pad), lambda i: (0, 0)),       # resident
                ],
                out_specs=pl.BlockSpec((tm, n_pad), lambda i: (i, 0)),
            ),
            compiler_params=pltpu.CompilerParams(
                dimension_semantics=("parallel",),
                vmem_limit_bytes=vmem_limit,
            ),
            cost_estimate=cost,
        )(xcol_p, w_p, b_p)

    return pl.pallas_call(
        _matmul_bias_elu_acc_kernel,
        out_shape=jax.ShapeDtypeStruct((out_rows, n_pad), out_dtype),
        grid_spec=pltpu.PrefetchScalarGridSpec(
            num_scalar_prefetch=0,
            grid=(grid_m, k_pad // tk),
            in_specs=[
                pl.BlockSpec((tm, tk), lambda i, k: (i, k)),
                pl.BlockSpec((tk, n_pad), lambda i, k: (k, 0)),
                pl.BlockSpec((1, n_pad), lambda i, k: (0, 0)),
            ],
            out_specs=pl.BlockSpec((tm, n_pad), lambda i, k: (i, 0)),
            scratch_shapes=[pltpu.VMEM((tm, n_pad), jnp.float32)],
        ),
        compiler_params=pltpu.CompilerParams(
            dimension_semantics=("parallel", "arbitrary"),
            vmem_limit_bytes=vmem_limit,
        ),
        cost_estimate=cost,
    )(xcol_p, w_p, b_p)


# ---------------------------------------------------------------------------
# ConvTransposed1d module forward
# ---------------------------------------------------------------------------
def _weight_norm(v, g):
    # torch.nn.utils.weight_norm default dim=0 on ConvTranspose1d weight
    # (Cin, Cout, K): w = g * v / ||v||, norm over dims (1, 2).
    norm = jnp.sqrt(jnp.sum(jnp.square(v), axis=(1, 2), keepdims=True))
    return g * v / norm


def conv_transposed1d_forward(params, x, *, stride, dilation=1,
                              compute_dtype=jnp.bfloat16):
    """Forward of the PyTorch `ConvTransposed1d` module.

    params: {"v": (Cin, Cout, K), "g": (Cin, 1, 1), "b": (Cout,)}
    x: (B, Cin, Lin)  ->  (B, Cout, Lin * stride)          (dilation == 1)
    """
    if dilation != 1:
        # TODO(synk): dilation > 1 is never used by SEANet's ConvTransposed1d;
        # the sub-pixel reformulation below assumes dilation == 1.
        raise NotImplementedError("dilation > 1 not supported")

    v, g, b = params["v"], params["g"], params["b"]
    Cin, Cout, K = v.shape
    s = int(stride)
    if K <= s:
        # PyTorch's x[..., :-pad] with pad = K - s <= 0 is not meaningful.
        raise ValueError("kernel_size must be > stride")
    B, Cin_x, Lin = x.shape
    assert Cin_x == Cin

    J = -(-K // s)                         # ceil(K / s) causal taps
    Kmat, N, M = J * Cin, s * Cout, B * Lin
    plan = _plan_tiles(M, Kmat, N, compute_dtype)
    k_pad, n_pad, m_pad = plan["k_pad"], plan["n_pad"], plan["m_pad"]

    # ---- weight / bias prep (tiny, f32) ------------------------------------
    w = _weight_norm(v.astype(jnp.float32), g.astype(jnp.float32))   # (Cin,Cout,K)
    # Sub-pixel weight: W[j*Cin+ci, r*Cout+co] = w[ci, co, r + j*s]
    w_full = jnp.pad(w, ((0, 0), (0, 0), (0, J * s - K)))            # zero taps >= K
    w_mat = jnp.transpose(w_full.reshape(Cin, Cout, J, s), (2, 0, 3, 1))
    w_mat = w_mat.reshape(Kmat, N)
    w_p = jnp.pad(w_mat, ((0, k_pad - Kmat), (0, n_pad - N))).astype(compute_dtype)
    b_p = jnp.pad(jnp.tile(b.astype(jnp.float32), s), (0, n_pad - N)).reshape(1, n_pad)

    # ---- causal J-tap im2col, built directly in compute_dtype with the
    #      kernel's (m_pad, k_pad) padding fused in (one pass over J*x) ------
    x_t = jnp.transpose(x, (0, 2, 1)).astype(compute_dtype)          # (B, Lin, Cin)
    cols = [x_t] + [jnp.pad(x_t, ((0, 0), (j, 0), (0, 0)))[:, :Lin, :]
                    for j in range(1, J)]
    xcol = jnp.concatenate(cols, axis=-1).reshape(M, Kmat)
    xcol_p = jnp.pad(xcol, ((0, m_pad - M), (0, k_pad - Kmat)))

    # ---- fused kernel -------------------------------------------------------
    out2d = _fused_matmul_bias_elu(xcol_p, w_p, b_p, plan, out_rows=M)
    if n_pad != N:                        # only when s*Cout isn't lane-aligned
        out2d = out2d[:, :N]
    out = out2d.reshape(B, Lin * s, Cout)                 # fold phases -> time
    # Channel-major to match the PyTorch module; transpose happens in
    # compute_dtype and XLA fuses the final cast into it.
    return jnp.transpose(out, (0, 2, 1)).astype(x.dtype)  # (B, Cout, Lin*s)


# ---------------------------------------------------------------------------
# Pure-JAX f32 reference (independent scatter-add formulation) for checking
# ---------------------------------------------------------------------------
def _reference_forward(x, w, b, stride, dilation=1):
    B, Cin, Lin = x.shape
    _, Cout, K = w.shape
    l_full = (Lin - 1) * stride + dilation * (K - 1) + 1
    out = jnp.zeros((B, Cout, l_full), jnp.float32)
    prod = jnp.einsum("bci,cok->bkoi", x.astype(jnp.float32),
                      w.astype(jnp.float32))                  # (B, K, Cout, Lin)
    for k in range(K):
        start = k * dilation
        out = out.at[:, :, start:start + (Lin - 1) * stride + 1:stride].add(
            prod[:, k])
    out = out + b[None, :, None]
    pad = dilation * (K - 1) - dilation * (stride - 1)
    out = out[:, :, :l_full - pad]
    return jnp.where(out > 0, out, jnp.expm1(jnp.minimum(out, 0.0)))


# ---------------------------------------------------------------------------
if __name__ == "__main__":
    key = jax.random.PRNGKey(0)

    # Small configs consistent with SEANet decoder usage (kernel = 2*stride),
    # plus one where kernel_size is not a multiple of stride.
    configs = [
        dict(B=2, Cin=64, Cout=32, Lin=24, K=16, stride=8),
        dict(B=2, Cin=32, Cout=16, Lin=16, K=4, stride=2),
        dict(B=1, Cin=16, Cout=8, Lin=12, K=7, stride=3),
    ]

    for cfg in configs:
        B, Cin, Cout = cfg["B"], cfg["Cin"], cfg["Cout"]
        Lin, K, s = cfg["Lin"], cfg["K"], cfg["stride"]
        key, kv, kg, kb, kx = jax.random.split(key, 5)
        scale = (Cin * K) ** -0.5
        params = {
            "v": jax.random.uniform(kv, (Cin, Cout, K), jnp.float32, -scale, scale),
            "g": jax.random.uniform(kg, (Cin, 1, 1), jnp.float32, 0.5, 1.5),
            "b": jax.random.uniform(kb, (Cout,), jnp.float32, -scale, scale),
        }
        x = jax.random.normal(kx, (B, Cin, Lin), jnp.float32)

        w_eff = _weight_norm(params["v"], params["g"])
        ref = jax.block_until_ready(
            _reference_forward(x, w_eff, params["b"], s))

        # f32 compute path: tight check of the kernel math / tiling.
        out_f32 = jax.block_until_ready(
            conv_transposed1d_forward(params, x, stride=s,
                                      compute_dtype=jnp.float32))
        assert out_f32.shape == (B, Cout, Lin * s), out_f32.shape
        assert out_f32.shape == ref.shape
        assert float(jnp.max(jnp.abs(out_f32 - ref))) < 1e-4

        # bf16 compute path (default, bandwidth-optimized): relative check.
        out_bf16 = jax.block_until_ready(
            conv_transposed1d_forward(params, x, stride=s))
        assert out_bf16.shape == ref.shape
        assert bool(jnp.all(jnp.isfinite(out_bf16)))
        tol = 5e-2 * (1.0 + float(jnp.max(jnp.abs(ref))))
        assert float(jnp.max(jnp.abs(out_bf16.astype(jnp.float32) - ref))) < tol

    print("KERNEL_OK")
</pallas_src>

<mosaic_0001>
module attributes {stable_mosaic.version = 11 : i64} {
  func.func @_matmul_bias_elu_kernel(%arg0: i32, %arg1: memref<24x128xf32, #tpu.memory_space<vmem>>, %arg2: memref<128x256xf32, #tpu.memory_space<vmem>>, %arg3: memref<1x256xf32, #tpu.memory_space<vmem>>, %arg4: memref<24x256xf32, #tpu.memory_space<vmem>>) attributes {dimension_semantics = [#tpu.dimension_semantics<parallel>], iteration_bounds = array<i64: 2>, scalar_prefetch = 0 : i64, scratch_operands = 0 : i64, tpu.core_type = #tpu.core_type<tc>, window_params = [{transform_indices = @transform_0, window_bounds = array<i64: 24, 128>}, {pipeline_mode = #tpu.pipeline_mode<synchronous>, transform_indices = @transform_1, window_bounds = array<i64: 128, 256>}, {pipeline_mode = #tpu.pipeline_mode<synchronous>, transform_indices = @transform_2, window_bounds = array<i64: 1, 256>}, {transform_indices = @transform_3, window_bounds = array<i64: 24, 256>}]} {
    %c0 = arith.constant 0 : index
    %c0_0 = arith.constant 0 : index
    %0 = vector.load %arg1[%c0, %c0_0] : memref<24x128xf32, #tpu.memory_space<vmem>>, vector<24x128xf32>
    %c0_1 = arith.constant 0 : index
    %c0_2 = arith.constant 0 : index
    %1 = vector.load %arg2[%c0_1, %c0_2] : memref<128x256xf32, #tpu.memory_space<vmem>>, vector<128x256xf32>
    %cst = arith.constant dense<0.000000e+00> : vector<24x256xf32>
    %2 = tpu.matmul %0, %1, %cst {dimension_numbers = #tpu.dot_dimension_numbers<[1], [0], [0], [1], [0, 0, 1, 1], [], []>} : vector<24x128xf32>, vector<128x256xf32>, vector<24x256xf32> -> vector<24x256xf32>
    %c0_3 = arith.constant 0 : index
    %c0_4 = arith.constant 0 : index
    %3 = vector.load %arg3[%c0_3, %c0_4] : memref<1x256xf32, #tpu.memory_space<vmem>>, vector<1x256xf32>
    %4 = vector.broadcast %3 : vector<1x256xf32> to vector<24x256xf32>
    %5 = arith.addf %2, %4 : vector<24x256xf32>
    %cst_5 = arith.constant 0.000000e+00 : f32
    %6 = vector.broadcast %cst_5 : f32 to vector<24x256xf32>
    %7 = arith.cmpf ogt, %5, %6 : vector<24x256xf32>
    %cst_6 = arith.constant 0.000000e+00 : f32
    %8 = vector.broadcast %cst_6 : f32 to vector<24x256xf32>
    %9 = arith.minimumf %5, %8 : vector<24x256xf32>
    %10 = math.exp %9 : vector<24x256xf32>
    %cst_7 = arith.constant 1.000000e+00 : f32
    %11 = vector.broadcast %cst_7 : f32 to vector<24x256xf32>
    %12 = arith.subf %10, %11 : vector<24x256xf32>
    %13 = arith.select %7, %5, %12 : vector<24x256xi1>, vector<24x256xf32>
    %c0_8 = arith.constant 0 : index
    %c0_9 = arith.constant 0 : index
    %14 = vector.load %arg4[%c0_8, %c0_9] : memref<24x256xf32, #tpu.memory_space<vmem>>, vector<24x256xf32>
    tpu.vector_store %arg4[%c0_8, %c0_9], %13 {strides = array<i32>} : memref<24x256xf32, #tpu.memory_space<vmem>>, vector<24x256xf32>,
    return
  }
  func.func @transform_0(%arg0: i32) -> (i32, i32) {
    %c0_i32 = arith.constant 0 : i32
    %c0_i32_0 = arith.constant 0 : i32
    return %arg0, %c0_i32 : i32, i32
  }
  func.func @transform_1(%arg0: i32) -> (i32, i32) {
    %c0_i32 = arith.constant 0 : i32
    %c0_i32_0 = arith.constant 0 : i32
    %c0_i32_1 = arith.constant 0 : i32
    return %c0_i32, %c0_i32_0 : i32, i32
  }
  func.func @transform_2(%arg0: i32) -> (i32, i32) {
    %c0_i32 = arith.constant 0 : i32
    %c0_i32_0 = arith.constant 0 : i32
    %c0_i32_1 = arith.constant 0 : i32
    return %c0_i32, %c0_i32_0 : i32, i32
  }
  func.func @transform_3(%arg0: i32) -> (i32, i32) {
    %c0_i32 = arith.constant 0 : i32
    %c0_i32_0 = arith.constant 0 : i32
    return %arg0, %c0_i32 : i32, i32
  }
}

</mosaic_0001>

<bundles_post_ra>
// kernel: tpu_custom_call.1
= control target key start
LH: loop header
LB: loop body
LE: loop exit
PB: predicated region body
PF: predicated region fallthrough
CT: control target
= control target key end

     0   :  { %8 = vsyncpa [#allocation3], 0  ;;  %s997_s0 = inlined_call_operand.hbm [shape: f32[48,128], index: 0, kind: input, shape index: {}]   ;;  %s998_s1 = inlined_call_operand.hbm [shape: f32[128,256], index: 1, kind: input, shape index: {}]   ;;  %s999_s2 = inlined_call_operand.vmem [shape: f32[1,256], index: 2, kind: input, shape index: {}]   ;;  %s1000_s3 = inlined_call_operand.hbm [shape: f32[48,256], index: 3, kind: output, shape index: {}]  }
   0x1   :  { %10 = vsyncpa [#allocation3 + $0x1], 0 }
   0x2   :  { %11 = vsyncpa [#allocation6], 0 }
   0x3   :  { %12 = vsyncpa [#allocation4], 0 }
   0x4   :  { %14 = vsyncpa [#allocation4 + $0x1], 0  ;;  %s784_s12 = smov 0   ;;  %s786_s13 = smov 0  }
   0x5   :  { %s788_s14 = smov 0   ;;  %s790_s15 = smov 0  }
   0x6 LB: > { %s805_s16 = sadd.s32 4294967295, %s752_s15   ;;  %s476_s17 = sadd.s32 4294967294, %s752_s15   ;;  %s752_s15 = sphi %s790_s15, %s1020_s15   ;;  %s748_s14 = sphi %s788_s14, %s1019_s14   ;;  %s744_s13 = sphi %s786_s13, %s1018_s13   ;;  %s740_s12 = sphi %s784_s12, %s1017_s12  }
   0x7   : > { %p40_p0 = scmp.ne.s32.totalorder %s744_s13, %s740_s12  ;;  %p1001_p1 = scmp.eq.s32.totalorder %s805_s16, 0 }
   0x8   : > { %p112_p3 = scmp.eq.s32.totalorder %s476_s17, 1  ;;  %p477_p5 = scmp.ge.s32.totalorder %s752_s15, 1 }
   0x9   : > { %p814_p4 = por %p1001_p1, %p40_p0  ;;  %p119_p7 = scmp.lt.s32.totalorder %s752_s15, 3 }
   0xa   : > { %p819_p6 = por %p112_p3, %p40_p0  ;;  %s754_s21 = smov [#allocation5]  }
   0xb   : > { %s1004_s18 = scalar_select %p814_p4, 1, 0 }
   0xc   : > { %s1005_s19 = scalar_select %p819_p6, 1, 0 }
   0xd   : > { %p824_p8 = pnand %p477_p5, %p119_p7  ;;  %s131_s22 = sshll.u32 %s754_s21, 4  ;;  %s828_s22 = int_to_ptr.vmem [resolvable:$true] %s131_s22 }
   0xe   : > { %s840_s24 = sadd.s32 1, %s752_s15   ;;  %s27_s25 = sadd.s32 1, %s748_s14 }
   0xf   : > { %s1006_s20 = scalar_select %p824_p8, 1, 0 }
  0x10   : > { %p556_p9 = pneg %p824_p8  ;;  %s24_s26 = ssub.s32 %s752_s15, %s840_s24 }
  0x11   : > { %s624_s29 = scalar_lea.hbm %s998_s1, 4096 }
  0x12   : > { %p835_p11 = pnand %p556_p9, %p1001_p1  ;;  %p625_p12 = scmp.ne.s32.totalorder %s998_s1, %s624_s29 }
  0x13   : > { %p631_p5 = scmp.lt.u32.totalorder %s624_s29, %s998_s1 }
  0x14   : > { %p626_p13 = pneg %p835_p11 }
  0x16   : > { %p627_p0 = pnand %p626_p13, %p625_p12 }
  0x18   : > { %p628_p3 = pneg %p627_p0 }
  0x1a   : > { %p633_p7 = pnand %p631_p5, %p628_p3 }
  0x1c   : > { %636 = shalt.err (!%p633_p7)
}
  0x1d   : > { %s637_s7 = scalar_lea.vmem %s828_s22, 4096  ;;  %p645_p2 = scmp.lt.s32.totalorder %s828_s22, %s828_s22 }
  0x1e   : > { %p638_p9 = scmp.ne.s32.totalorder %s828_s22, %s637_s7  ;;  %p646_p6 = scmp.lt.s32.totalorder %s637_s7, %s637_s7 }
  0x20   : > { %p640_p10 = pnand %p638_p9, %p626_p13  ;;  %p647_p4 = por %p646_p6, %p645_p2 }
  0x22   : > { %p641_p1 = pneg %p640_p10 }
  0x24   : > { %p648_p8 = pnand %p647_p4, %p641_p1 }
  0x26   : > { %651 = shalt.err (!%p648_p8)
}
  0x27   : > { %s755_s8 = smov 256   ;;  %s756_s9 = smov 16  }
  0x28   : > { %559 = dma.hbm_to_vmem [thread:$0]  (!%p835_p11), %s998_s1, 4096, %s828_s22, [#allocation6], %s755_s8, %s755_s8, %s756_s9  }
  0x29   : > { %p25_p2 = scmp.eq.s32.totalorder %s24_s26, 0  ;;  %p34_p1 = scmp.ne.s32.totalorder %s748_s14, %s744_s13 }
  0x2a   : > { %p35_p4 = scmp.eq.s32.totalorder %s752_s15, 0  ;;  %p569_p6 = scmp.lt.s32.totalorder %s752_s15, 2 }
  0x2b   : > { %s871_s17 = scalar_select %p25_p2, %s748_s14, %s27_s25  }
  0x2c   : > { %p36_p8 = por %p35_p4, %p34_p1  ;;  %p1008_p10 = scmp.eq.s32.totalorder %s805_s16, 1 }
  0x2d   : > { %s148_s27 = sand.u32 1, %s748_s14   ;;  %s493_s28 = smul.u32 384, %s752_s15 }
  0x2e   : > { %p875_p12 = por %p1008_p10, %p34_p1  ;;  %s545_s29 = smul.u32 24, %s148_s27 }
  0x2f   : > { %s884_s4 = scalar_lea.hbm %s997_s0, %s493_s28  ;;  %p886_p11 = pnand %p569_p6, %p36_p8 }
  0x30   : > { %s152_s25 = scalar_lea.vmem [#allocation2], %s545_s29  ;;  %s892_s5 = scalar_lea.sflag [#allocation3], %s148_s27 }
  0x31   : > { %s159_s26 = sshll.u32 %s152_s25, 4  ;;  %s652_s6 = scalar_lea.hbm %s884_s4, 384  ;;  %s890_s26 = int_to_ptr.vmem [resolvable:$true] %s159_s26 }
  0x32   : > { %p653_p13 = scmp.ne.s32.totalorder %s884_s4, %s652_s6  ;;  %p654_p0 = pneg %p886_p11 }
  0x33   : > { %s657_s9 = scalar_lea.hbm %s997_s0, 768  ;;  %p658_p7 = scmp.lt.u32.totalorder %s884_s4, %s997_s0 }
  0x34   : > { %p655_p3 = pnand %p654_p0, %p653_p13  ;;  %p659_p9 = scmp.lt.u32.totalorder %s657_s9, %s652_s6 }
  0x35   : > { %p661_p1 = scmp.lt.u32.totalorder %s652_s6, %s884_s4 }
  0x36   : > { %p656_p5 = pneg %p655_p3  ;;  %p660_p2 = por %p659_p9, %p658_p7 }
  0x38   : > { %p662_p4 = por %p661_p1, %p660_p2 }
  0x3a   : > { %p663_p6 = pnand %p662_p4, %p656_p5 }
  0x3c   : > { %666 = shalt.err (!%p663_p6)
}
  0x3d   : > { %s667_s27 = scalar_lea.vmem %s890_s26, 384  ;;  %s757_s28 = smov [#allocation2]  }
  0x3e   : > { %p668_p8 = scmp.ne.s32.totalorder %s890_s26, %s667_s27  ;;  %s672_s29 = sshll.u32 %s757_s28, 4  ;;  %s673_s29 = int_to_ptr.vmem [resolvable:$false] %s672_s29 }
  0x3f   : > { %s674_s23 = scalar_lea.vmem %s673_s29, 768  ;;  %p675_p3 = scmp.lt.s32.totalorder %s890_s26, %s673_s29 }
  0x40   : > { %p670_p10 = pnand %p668_p8, %p654_p0  ;;  %p676_p7 = scmp.lt.s32.totalorder %s674_s23, %s667_s27 }
  0x42   : > { %p671_p13 = pneg %p670_p10  ;;  %p677_p9 = por %p676_p7, %p675_p3 }
  0x44   : > { %p678_p2 = pnand %p677_p9, %p671_p13 }
  0x46   : > { %681 = shalt.err (!%p678_p2)
}
  0x47   : > { %s758_s30 = smov 128   ;;  %s759_s25 = smov 8  }
  0x48   : > { %563 = dma.hbm_to_vmem [thread:$0]  (!%p886_p11), %s884_s4, 384, %s890_s26, %s892_s5, %s758_s30, %s758_s30, %s759_s25  }
  0x49   : > { %p1011_p0 = scmp.ne.s32.totalorder %s1006_s20, 0 }
  0x4a   : > { %s923_s6 = sand.u32 (!%p1011_p0), 1, %s744_s13   ;;  %p1012_p5 = scmp.ne.s32.totalorder (!%p1011_p0), %s1004_s18, 0 }
  0x4b   : > { %171 = sbr.rel (%p1011_p0) target bundleno = 373 (0x175), region = 32  ;;  %s174_s8 = scalar_lea.sflag (!%p1011_p0), [#allocation3], %s923_s6 }
  0x4c   : > { %s546_s7 = smul.u32 (!%p1011_p0), 24, %s923_s6 }
  0x4e   : > { %s927_s9 = scalar_lea.vmem (!%p1011_p0), [#allocation2], %s546_s7 }
  0x52   : > { %727 = dma.done.wait (%p1012_p5), %s174_s8, 384  }
  0x53   : > { %729 = vsyncadd (%p1012_p5), %s174_s8, 4294966912  ;;  %p1013_p11 = scmp.eq.s32.totalorder %s805_s16, 0 }
  0x55   : > { %731 = dma.done.wait (%p1013_p11), [#allocation6], 4096   ;;  %p1014_p1 = pmov %p1013_p11 }
  0x56   : > { %v760_v0 = vmov 0.0   ;;  %v210_v1 = vld [vmem:[#allocation5 + $0x8] sm:$0xff]  ;;  %v212_v2 = vld [vmem:[#allocation5 + $0x18] sm:$0xff]  ;;  %v209_v3 = vld [vmem:[#allocation5] sm:$0xff]  ;;  %v243_v52 = vlaneseq  ;;  %s547_s4 = smul.u32 48, %s923_s6  ;;  %s379_s27 = scalar_lea.sflag [#allocation4], %s923_s6 }
  0x57   : > { %733 = vsyncadd (%p1014_p1), [#allocation6], 4294963200  ;;  %317 = vmatprep.mubr.f32.mxu0 %v760_v0  ;;  %323 = vmatprep.mubr.f32.mxu1 %v760_v0  ;;  %v497_v4 = vpack.c.bf16 %v212_v2, %v210_v1  ;;  %v211_v5 = vld [vmem:[#allocation5 + $0x10] sm:$0xff]  ;;  %v214_v6 = vld [vmem:[#allocation5 + $0x28] sm:$0xff]  ;;  %s496_s5 = smul.u32 768, %s805_s16  ;;  %s761_s29 = smov [#allocation7]  }
  0x58   : > { %v216_v7 = vld [vmem:[#allocation5 + $0x38] sm:$0xff]  ;;  %v499_v8 = vpack.c.bf16 %v211_v5, %v209_v3  ;;  %v213_v10 = vld [vmem:[#allocation5 + $0x20] sm:$0xff]  ;;  %v215_v11 = vld [vmem:[#allocation5 + $0x30] sm:$0xff]  ;;  %v244_v53 = vshrl.u32 %v243_v52, 7  ;;  %s203_s22 = scalar_lea.vmem [#allocation7], %s547_s4  ;;  %s686_s23 = sshll.u32 %s761_s29, 4  ;;  %s687_s23 = int_to_ptr.vmem [resolvable:$false] %s686_s23 }
  0x59   : > { %v501_v9 = vpack.c.bf16 %v216_v7, %v214_v6  ;;  %v218_v12 = vld [vmem:[#allocation5 + $0x48] sm:$0xff]  ;;  %498 = vmatprep.subr.bf16.mxu0 %v497_v4  ;;  %529 = vmatprep.subr.bf16.mxu1 %v497_v4  ;;  %v220_v13 = vld [vmem:[#allocation5 + $0x58] sm:$0xff]  ;;  %v503_v14 = vpack.c.bf16 %v215_v11, %v213_v10  ;;  %v217_v16 = vld [vmem:[#allocation5 + $0x40] sm:$0xff]  ;;  %s393_s26 = sshll.u32 %s203_s22, 4  ;;  %s953_s11 = scalar_lea.hbm %s1000_s3, %s496_s5  ;;  %s948_s26 = int_to_ptr.vmem [resolvable:$true] %s393_s26 }
  0x5a   : > { %500 = vmatpush1.bf16.msra.mxu0 %v499_v8  ;;  %537 = vmatpush1.bf16.msra.mxu1 %v499_v8  ;;  %v505_v15 = vpack.c.bf16 %v220_v13, %v218_v12  ;;  %v219_v17 = vld [vmem:[#allocation5 + $0x50] sm:$0xff]  ;;  %v222_v18 = vld [vmem:[#allocation5 + $0x68] sm:$0xff]  ;;  %v224_v19 = vld [vmem:[#allocation5 + $0x78] sm:$0xff]  ;;  %v245_v54 = vsub.s32 0, %v244_v53  ;;  %v249_v56 = vsub.s32 1, %v244_v53  ;;  %s682_s28 = scalar_lea.vmem %s948_s26, 768  ;;  %p689_p10 = scmp.lt.s32.totalorder %s948_s26, %s687_s23 }
  0x5b   : > { %502 = vmatprep.subr.bf16.mxu0 %v501_v9  ;;  %530 = vmatprep.subr.bf16.mxu1 %v501_v9  ;;  %v507_v20 = vpack.c.bf16 %v219_v17, %v217_v16  ;;  %v509_v21 = vpack.c.bf16 %v224_v19, %v222_v18  ;;  %v221_v22 = vld [vmem:[#allocation5 + $0x60] sm:$0xff]  ;;  %v223_v23 = vld [vmem:[#allocation5 + $0x70] sm:$0xff]  ;;  %v226_v24 = vld [vmem:[#allocation5 + $0x88] sm:$0xff]  ;;  %p683_p4 = scmp.ne.s32.totalorder %s948_s26, %s682_s28  ;;  %s688_s30 = scalar_lea.vmem %s687_s23, 1536 }
  0x5c   : > { %v228_v25 = vld [vmem:[#allocation5 + $0x98] sm:$0xff]  ;;  %v511_v26 = vpack.c.bf16 %v223_v23, %v221_v22  ;;  %v225_v28 = vld [vmem:[#allocation5 + $0x80] sm:$0xff]  ;;  %v227_v29 = vld [vmem:[#allocation5 + $0x90] sm:$0xff]  ;;  %p690_p13 = scmp.lt.s32.totalorder %s688_s30, %s682_s28 }
  0x5d   : > { %v513_v27 = vpack.c.bf16 %v228_v25, %v226_v24  ;;  %v230_v30 = vld [vmem:[#allocation5 + $0xa8] sm:$0xff]  ;;  %v232_v31 = vld [vmem:[#allocation5 + $0xb8] sm:$0xff]  ;;  %v515_v32 = vpack.c.bf16 %v227_v29, %v225_v28  ;;  %v229_v34 = vld [vmem:[#allocation5 + $0xa0] sm:$0xff]  ;;  %p684_p6 = pnand %p683_p4, %p875_p12 }
  0x5e   : > { %504 = vmatpush1.bf16.msra.mxu0 %v503_v14  ;;  %538 = vmatpush1.bf16.msra.mxu1 %v503_v14  ;;  %v517_v33 = vpack.c.bf16 %v232_v31, %v230_v30  ;;  %v231_v35 = vld [vmem:[#allocation5 + $0xb0] sm:$0xff]  ;;  %v234_v36 = vld [vmem:[#allocation5 + $0xc8] sm:$0xff]  ;;  %v236_v37 = vld [vmem:[#allocation5 + $0xd8] sm:$0xff]  ;;  %p691_p3 = por %p690_p13, %p689_p10 }
  0x5f   : > { %506 = vmatprep.subr.bf16.mxu0 %v505_v15  ;;  %531 = vmatprep.subr.bf16.mxu1 %v505_v15  ;;  %v519_v38 = vpack.c.bf16 %v231_v35, %v229_v34  ;;  %v521_v39 = vpack.c.bf16 %v236_v37, %v234_v36  ;;  %v233_v40 = vld [vmem:[#allocation5 + $0xc0] sm:$0xff]  ;;  %v235_v41 = vld [vmem:[#allocation5 + $0xd0] sm:$0xff]  ;;  %v238_v42 = vld [vmem:[#allocation5 + $0xe8] sm:$0xff]  ;;  %p685_p8 = pneg %p684_p6 }
  0x60   : > { %v240_v43 = vld [vmem:[#allocation5 + $0xf8] sm:$0xff]  ;;  %v523_v44 = vpack.c.bf16 %v235_v41, %v233_v40  ;;  %v237_v46 = vld [vmem:[#allocation5 + $0xe0] sm:$0xff]  ;;  %v239_v47 = vld [vmem:[#allocation5 + $0xf0] sm:$0xff] }
  0x61   : > { %v525_v45 = vpack.c.bf16 %v240_v43, %v238_v42  ;;  %v527_v48 = vpack.c.bf16 %v239_v47, %v237_v46  ;;  %v206_v49 = vld [vmem:[%s927_s9] sm:$0xff]  ;;  %v207_v50 = vld [vmem:[%s927_s9 + $0x8] sm:$0xff]  ;;  %v208_v51 = vld [vmem:[%s927_s9 + $0x10] sm:$0xff]  ;;  %p692_p7 = pnand %p691_p3, %p685_p8 }
  0x62   : > { %508 = vmatpush1.bf16.msra.mxu0 %v507_v20  ;;  %539 = vmatpush1.bf16.msra.mxu1 %v507_v20  ;;  %v241_v55 = vld [vmem:[%s999_s2] sm:$0x3] }
  0x63   : > { %510 = vmatprep.subr.bf16.mxu0 %v509_v21  ;;  %532 = vmatprep.subr.bf16.mxu1 %v509_v21  ;;  %v246_v57 = vrot.slane %v241_v55, %v245_v54  ;;  %v250_v58 = vrot.slane %v241_v55, %v249_v56 }
  0x66   : > { %512 = vmatpush1.bf16.msra.mxu0 %v511_v26  ;;  %540 = vmatpush1.bf16.msra.mxu1 %v511_v26 }
  0x67   : > { %514 = vmatprep.subr.bf16.mxu0 %v513_v27  ;;  %533 = vmatprep.subr.bf16.mxu1 %v513_v27 }
  0x6a   : > { %516 = vmatpush1.bf16.msra.mxu0 %v515_v32  ;;  %541 = vmatpush1.bf16.msra.mxu1 %v515_v32 }
  0x6b   : > { %518 = vmatprep.subr.bf16.mxu0 %v517_v33  ;;  %534 = vmatprep.subr.bf16.mxu1 %v517_v33 }
  0x6e   : > { %520 = vmatpush1.bf16.msra.mxu0 %v519_v38  ;;  %542 = vmatpush1.bf16.msra.mxu1 %v519_v38 }
  0x6f   : > { %522 = vmatprep.subr.bf16.mxu0 %v521_v39  ;;  %535 = vmatprep.subr.bf16.mxu1 %v521_v39 }
  0x72   : > { %524 = vmatpush1.bf16.msra.mxu0 %v523_v44  ;;  %543 = vmatpush1.bf16.msra.mxu1 %v523_v44 }
  0x73   : > { %526 = vmatprep.subr.bf16.mxu0 %v525_v45  ;;  %536 = vmatprep.subr.bf16.mxu1 %v525_v45 }
  0x76   : > { %528 = vmatpush1.bf16.msra.mxu0 %v527_v48  ;;  %544 = vmatpush1.bf16.msra.mxu1 %v527_v48 }
  0x79   : > { %318 = vmatmul.mubr.f32.vlgmr.msra.gmra.mrb[0].mxu0 %v206_v49  ;;  %324 = vmatmul.mubr.f32.vlgmr.msra.gmra.mrb[0].mxu1 %v207_v50 }
  0x7a   : > { %329 = vmatprep.mubr.f32.mxu1 %v760_v0 }
  0x7d   : > { %330 = vmatmul.mubr.f32.gmra.mrb[2].mxu1 %v208_v51 }
 0x14c   : > { %v319_v59 = vpop.f32.mrb[0].mxu0  ;;  %v325_v60 = vpop.f32.mrb[0].mxu1 }
 0x14d   : > { %v320_v61 = vadd.f32 %v319_v59, %v246_v57  ;;  %v326_v62 = vadd.f32 %v325_v60, %v246_v57  ;;  %v321_v63 = vpop.f32.mrb[1].mxu0  ;;  %v327_v1 = vpop.f32.mrb[1].mxu1 }
 0x14e   : > { %v322_v2 = vadd.f32 %v321_v63, %v250_v58  ;;  %v328_v0 = vadd.f32 %v327_v1, %v250_v58 }
 0x14f   : > { %v342_v3 = vmin.f32 %v320_v61, 0.0  ;;  %v344_v4 = vmin.f32 %v326_v62, 0.0  ;;  %vm336_vm0 = vcmp.gt.f32.partialorder %v320_v61, 0.0  ;;  %vm338_vm1 = vcmp.gt.f32.partialorder %v326_v62, 0.0 }
 0x150   : > { %v343_v5 = vmin.f32 %v322_v2, 0.0  ;;  %v345_v6 = vmin.f32 %v328_v0, 0.0  ;;  %v331_v7 = vpop.f32.mrb[2].mxu1  ;;  %vm337_vm2 = vcmp.gt.f32.partialorder %v322_v2, 0.0  ;;  %vm339_vm3 = vcmp.gt.f32.partialorder %v328_v0, 0.0 }
 0x151   : > { %v348_v8 = vmul.f32 1.442695, %v342_v3  ;;  %v352_v9 = vmul.f32 1.442695, %v344_v4  ;;  %v332_v10 = vadd.f32 %v331_v7, %v246_v57  ;;  %v333_v11 = vpop.f32.mrb[3].mxu1 }
 0x152   : > { %v350_v12 = vmul.f32 1.442695, %v343_v5  ;;  %v354_v13 = vmul.f32 1.442695, %v345_v6  ;;  %v334_v14 = vadd.f32 %v333_v11, %v250_v58 }
 0x153   : > { %612 = vpow2.f32 %v348_v8  ;;  %v346_v15 = vmin.f32 %v332_v10, 0.0  ;;  %vm340_vm4 = vcmp.gt.f32.partialorder %v332_v10, 0.0 }
 0x154   : > { %614 = vpow2.f32 %v352_v9  ;;  %v347_v16 = vmin.f32 %v334_v14, 0.0  ;;  %vm341_vm5 = vcmp.gt.f32.partialorder %v334_v14, 0.0 }
 0x155   : > { %616 = vpow2.f32 %v350_v12  ;;  %v356_v17 = vmul.f32 1.442695, %v346_v15 }
 0x156   : > { %618 = vpow2.f32 %v354_v13  ;;  %v358_v18 = vmul.f32 1.442695, %v347_v16 }
 0x157   : > { %620 = vpow2.f32 %v356_v17 }
 0x158   : > { %622 = vpow2.f32 %v358_v18 }
 0x15d   : > { %v613_v19 = vpop.eup %612 }
 0x15e   : > { %v615_v20 = vpop.eup %614  ;;  %v483_v21 = vadd.f32 -1.0, %v613_v19 }
 0x15f   : > { %v617_v22 = vpop.eup %616  ;;  %v485_v23 = vadd.f32 -1.0, %v615_v20 }
 0x160   : > { %v619_v24 = vpop.eup %618  ;;  %v366_v25 = vsel %vm336_vm0, %v320_v61, %v483_v21  ;;  %v484_v26 = vadd.f32 -1.0, %v617_v22 }
 0x161   : > { %v621_v27 = vpop.eup %620  ;;  %372 = vst [vmem:[%s203_s22] sm:$0xff] %v366_v25  ;;  %v368_v28 = vsel %vm338_vm1, %v326_v62, %v485_v23  ;;  %v486_v29 = vadd.f32 -1.0, %v619_v24 }
 0x162   : > { %v623_v30 = vpop.eup %622  ;;  %374 = vst [vmem:[%s203_s22 + $0x10] sm:$0xff] %v368_v28  ;;  %v367_v31 = vsel %vm337_vm2, %v322_v2, %v484_v26  ;;  %v487_v32 = vadd.f32 -1.0, %v621_v27 }
 0x163   : > { %373 = vst [vmem:[%s203_s22 + $0x8] sm:$0xff] %v367_v31  ;;  %v369_v33 = vsel %vm339_vm3, %v328_v0, %v486_v29  ;;  %v488_v34 = vadd.f32 -1.0, %v623_v30 }
 0x164   : > { %375 = vst [vmem:[%s203_s22 + $0x18] sm:$0xff] %v369_v33  ;;  %v370_v35 = vsel %vm340_vm4, %v332_v10, %v487_v32 }
 0x165   : > { %376 = vst [vmem:[%s203_s22 + $0x20] sm:$0xff] %v370_v35  ;;  %v371_v36 = vsel %vm341_vm5, %v334_v14, %v488_v34 }
 0x166   : > { %377 = vst [vmem:[%s203_s22 + $0x28] sm:$0xff] %v371_v36 }
 0x167   : > { %695 = shalt.err (!%p692_p7)
}
 0x168   : > { %s696_s25 = scalar_lea.hbm %s953_s11, 768  ;;  %s700_s9 = scalar_lea.hbm %s1000_s3, 1536 }
 0x169   : > { %p697_p9 = scmp.ne.s32.totalorder %s953_s11, %s696_s25  ;;  %p701_p5 = scmp.lt.u32.totalorder %s953_s11, %s1000_s3 }
 0x16a   : > { %p702_p11 = scmp.lt.u32.totalorder %s700_s9, %s696_s25  ;;  %p704_p4 = scmp.lt.u32.totalorder %s696_s25, %s953_s11 }
 0x16b   : > { %p698_p2 = pnand %p697_p9, %p875_p12 }
 0x16c   : > { %p703_p1 = por %p702_p11, %p701_p5 }
 0x16d   : > { %p699_p0 = pneg %p698_p2 }
 0x16e   : > { %p705_p6 = por %p704_p4, %p703_p1 }
 0x170   : > { %p706_p8 = pnand %p705_p6, %p699_p0 }
 0x172   : > { %709 = shalt.err (!%p706_p8)
}
 0x173   : > { %s762_s4 = smov 256   ;;  %s763_s22 = smov 16  }
 0x174   : > { %554 = dma.vmem_to_hbm [thread:$0]  (%p875_p12), %s948_s26, 768, %s953_s11, %s379_s27, %s762_s4, %s762_s4, %s763_s22  }
 0x175 PF: > { %s408_s5 = sand.u32 1, %s740_s12   ;;  %p1015_p10 = scmp.ne.s32.totalorder %s1005_s19, 0 }
 0x176   : > { %p1016_p13 = scmp.ge.s32.totalorder %s752_s15, 2  ;;  %s409_s16 = scalar_lea.sflag [#allocation4], %s408_s5 }
 0x178   : > { %p565_p3 = pnand %p1016_p13, %p1015_p10 }
 0x17a   : > { %735 = dma.done.wait (!%p565_p3), %s409_s16, 768  }
 0x17b   : > { %737 = vsyncadd (!%p565_p3), %s409_s16, 4294966528  ;;  %p17_p7 = scmp.ge.s32.totalorder %s840_s24, 4   ;;  %s1017_s12 = smov %s744_s13 }
 0x17c   : > { %s1018_s13 = smov %s748_s14  ;;  %s1019_s14 = smov %s871_s17 }
 0x17d   : > { %s1020_s15 = smov %s840_s24  ;;  %19 = sbr.rel (!%p17_p7) target bundleno = 6 (0x6), region = 81 }
 0x184   :  { %414 = vsyncpa [#allocation3], 1 }
 0x185   :  { %416 = vsyncpa [#allocation3 + $0x1], 1 }
 0x186   :  { %417 = vsyncpa [#allocation6], 1 }
 0x187   :  { %418 = vsyncpa [#allocation4], 1 }
 0x188   :  { %420 = vsyncpa [#allocation4 + $0x1], 1 }

</bundles_post_ra>
